<compile_context>
chip_gen: v6e
topology: v6e:2x2x1
jax: 0.10.0
libtpu: 0.0.40
codegen_flags: <defaults>
</compile_context>

<pallas_src>
import math

import jax
import jax.numpy as jnp
from jax.experimental import pallas as pl
from jax.experimental.pallas import tpu as pltpu


def _round_up(x, m):
    return ((x + m - 1) // m) * m


# ----------------------------------------------------------------------------
# Pallas kernel: one multi-hot gather-and-sum matmul per (TM, E) row block
# ----------------------------------------------------------------------------
def fused_embedding_kernel(ids_ref, tbl_ref, out_ref):
    TM, E = out_ref.shape
    V = tbl_ref.shape[0]
    F = ids_ref.shape[1]                                   # number of fused features (5)

    iota = jax.lax.broadcasted_iota(jnp.int32, (TM, V), 1)  # (TM, V) column ids
    multihot = jnp.zeros((TM, V), jnp.float32)
    for c in range(F):                                      # static, tiny (F == 5)
        multihot = multihot + (iota == ids_ref[:, c:c + 1]).astype(jnp.float32)

    # Single MXU matmul: selects & sums the five table rows per token.
    out_ref[...] = jnp.dot(multihot, tbl_ref[...],
                           preferred_element_type=jnp.float32).astype(out_ref.dtype)


# ----------------------------------------------------------------------------
# Wrapper: fuse tables / ids, tile over B*S rows, reshape afterwards
# ----------------------------------------------------------------------------
def bert_embedding_forward(grid_ids, time_ids, event_ids, hand_ids,
                           grid_tbl, time_tbl, event_tbl, hand_tbl, pos_tbl,
                           *, tm=512):
    B, S = grid_ids.shape
    E = grid_tbl.shape[1]
    N = B * S

    # ---- fused table: [grid | time | event | hand | pos], rows padded to x8 ----
    tables = [grid_tbl, time_tbl, event_tbl, hand_tbl, pos_tbl]
    sizes = [int(t.shape[0]) for t in tables]
    offsets = [0]
    for v in sizes[:-1]:
        offsets.append(offsets[-1] + v)
    v_total = offsets[-1] + sizes[-1]
    v_pad = _round_up(v_total, 8)
    fused_tbl = jnp.concatenate([t.astype(jnp.float32) for t in tables], axis=0)
    if v_pad != v_total:
        fused_tbl = jnp.pad(fused_tbl, ((0, v_pad - v_total), (0, 0)))

    # ---- fused ids (N, 5): per-feature ids shifted by vocab offset + position ----
    pos_ids = jnp.broadcast_to(jnp.arange(S, dtype=jnp.int32)[None, :], (B, S))
    ids = jnp.stack([grid_ids.astype(jnp.int32) + offsets[0],
                     time_ids.astype(jnp.int32) + offsets[1],
                     event_ids.astype(jnp.int32) + offsets[2],
                     hand_ids.astype(jnp.int32) + offsets[3],
                     pos_ids + offsets[4]], axis=-1).reshape(N, 5)

    # ---- pad the row count to a multiple of the (8,128)-aligned tile ----
    TM = min(tm, _round_up(N, 8))
    n_pad = _round_up(N, TM)
    if n_pad != N:
        ids = jnp.pad(ids, ((0, n_pad - N), (0, 0)), constant_values=v_pad - 1)

    out = pl.pallas_call(
        fused_embedding_kernel,
        out_shape=jax.ShapeDtypeStruct((n_pad, E), jnp.float32),
        grid_spec=pltpu.PrefetchScalarGridSpec(
            num_scalar_prefetch=0,
            grid=(n_pad // TM,),
            in_specs=[pl.BlockSpec((TM, 5), lambda i: (i, 0)),        # ids block
                      pl.BlockSpec((v_pad, E), lambda i: (0, 0))],    # table, resident
            out_specs=pl.BlockSpec((TM, E), lambda i: (i, 0)),
        ),
        compiler_params=pltpu.CompilerParams(dimension_semantics=("parallel",)),
    )(ids, fused_tbl)

    return out[:N].reshape(B, S, E)


# ----------------------------------------------------------------------------
# Parameter / input construction (deterministic, in-script)
# ----------------------------------------------------------------------------
def sinusoidal_pe(max_len, d_model):
    pos = jnp.arange(max_len, dtype=jnp.float32)[:, None]
    div = jnp.exp(jnp.arange(0, d_model, 2, dtype=jnp.float32)
                  * (-math.log(10000.0) / d_model))
    pe = jnp.zeros((max_len, d_model), jnp.float32)
    pe = pe.at[:, 0::2].set(jnp.sin(pos * div))
    pe = pe.at[:, 1::2].set(jnp.cos(pos * div))
    return pe


if __name__ == "__main__":
    # config analogous to the PyTorch module's __init__
    config = dict(x_grid_nums=4, y_grid_nums=4, time_segment=8, event_num=5,
                  max_len=8, angle_embed_num=8, disp_embed_num=8)
    embed_size = 128
    B, S = 2, 8

    grid_vocab = (config['x_grid_nums'] + 1) * config['y_grid_nums'] + 3 + 1   # 24
    time_vocab = config['time_segment'] + 4                                    # 12
    event_vocab = config['event_num'] + 3                                      # 8
    hand_vocab = 4                                                             # left/right/pad/mask
    pos_max_len = config['max_len'] + 2                                        # 10

    key = jax.random.PRNGKey(0)
    k_gt, k_tt, k_et, k_ht, k_gi, k_ti, k_ei, k_hi = jax.random.split(key, 8)

    grid_tbl = 0.02 * jax.random.normal(k_gt, (grid_vocab, embed_size), jnp.float32)
    time_tbl = 0.02 * jax.random.normal(k_tt, (time_vocab, embed_size), jnp.float32)
    event_tbl = 0.02 * jax.random.normal(k_et, (event_vocab, embed_size), jnp.float32)
    hand_tbl = 0.02 * jax.random.normal(k_ht, (hand_vocab, embed_size), jnp.float32)
    pos_tbl = sinusoidal_pe(pos_max_len, embed_size)[:S]                        # (S, E)

    grid_ids = jax.random.randint(k_gi, (B, S), 0, grid_vocab, jnp.int32)
    time_ids = jax.random.randint(k_ti, (B, S), 0, time_vocab, jnp.int32)
    event_ids = jax.random.randint(k_ei, (B, S), 0, event_vocab, jnp.int32)
    hand_ids = jax.random.randint(k_hi, (B, S), 0, hand_vocab, jnp.int32)

    out = bert_embedding_forward(grid_ids, time_ids, event_ids, hand_ids,
                                 grid_tbl, time_tbl, event_tbl, hand_tbl, pos_tbl)
    out = jax.block_until_ready(out)

    # pure-JAX reference of the same forward pass (eval-mode dropout == identity)
    ref = (grid_tbl[grid_ids] + time_tbl[time_ids] + event_tbl[event_ids]
           + hand_tbl[hand_ids] + pos_tbl[None, :, :])

    assert out.shape == (B, S, embed_size)
    assert jnp.allclose(out, ref, atol=1e-5, rtol=1e-5), "mismatch vs reference"
    print("KERNEL_OK")
</pallas_src>

<mosaic_0001>
module attributes {stable_mosaic.version = 11 : i64} {
  func.func @fused_embedding_kernel(%arg0: i32, %arg1: memref<16x5xi32, #tpu.memory_space<vmem>>, %arg2: memref<56x128xf32, #tpu.memory_space<vmem>>, %arg3: memref<16x128xf32, #tpu.memory_space<vmem>>) attributes {dimension_semantics = [#tpu.dimension_semantics<parallel>], iteration_bounds = array<i64: 1>, scalar_prefetch = 0 : i64, scratch_operands = 0 : i64, tpu.core_type = #tpu.core_type<tc>, window_params = [{transform_indices = @transform_0, window_bounds = array<i64: 16, 5>}, {pipeline_mode = #tpu.pipeline_mode<synchronous>, transform_indices = @transform_1, window_bounds = array<i64: 56, 128>}, {transform_indices = @transform_2, window_bounds = array<i64: 16, 128>}]} {
    %0 = tpu.iota {dimensions = array<i32: 1>} : vector<16x56xi32>
    %cst = arith.constant 0.000000e+00 : f32
    %1 = vector.broadcast %cst : f32 to vector<16x56xf32>
    %c0 = arith.constant 0 : index
    %c0_0 = arith.constant 0 : index
    %2 = vector.load %arg1[%c0, %c0_0] : memref<16x5xi32, #tpu.memory_space<vmem>>, vector<16x1xi32>
    %3 = vector.broadcast %2 : vector<16x1xi32> to vector<16x56xi32>
    %4 = arith.cmpi eq, %0, %3 : vector<16x56xi32>
    %5 = arith.extui %4 : vector<16x56xi1> to vector<16x56xi32>
    %6 = arith.sitofp %5 : vector<16x56xi32> to vector<16x56xf32>
    %7 = arith.addf %1, %6 : vector<16x56xf32>
    %c0_1 = arith.constant 0 : index
    %c1 = arith.constant 1 : index
    %8 = vector.load %arg1[%c0_1, %c1] : memref<16x5xi32, #tpu.memory_space<vmem>>, vector<16x1xi32>
    %9 = vector.broadcast %8 : vector<16x1xi32> to vector<16x56xi32>
    %10 = arith.cmpi eq, %0, %9 : vector<16x56xi32>
    %11 = arith.extui %10 : vector<16x56xi1> to vector<16x56xi32>
    %12 = arith.sitofp %11 : vector<16x56xi32> to vector<16x56xf32>
    %13 = arith.addf %7, %12 : vector<16x56xf32>
    %c0_2 = arith.constant 0 : index
    %c2 = arith.constant 2 : index
    %14 = vector.load %arg1[%c0_2, %c2] : memref<16x5xi32, #tpu.memory_space<vmem>>, vector<16x1xi32>
    %15 = vector.broadcast %14 : vector<16x1xi32> to vector<16x56xi32>
    %16 = arith.cmpi eq, %0, %15 : vector<16x56xi32>
    %17 = arith.extui %16 : vector<16x56xi1> to vector<16x56xi32>
    %18 = arith.sitofp %17 : vector<16x56xi32> to vector<16x56xf32>
    %19 = arith.addf %13, %18 : vector<16x56xf32>
    %c0_3 = arith.constant 0 : index
    %c3 = arith.constant 3 : index
    %20 = vector.load %arg1[%c0_3, %c3] : memref<16x5xi32, #tpu.memory_space<vmem>>, vector<16x1xi32>
    %21 = vector.broadcast %20 : vector<16x1xi32> to vector<16x56xi32>
    %22 = arith.cmpi eq, %0, %21 : vector<16x56xi32>
    %23 = arith.extui %22 : vector<16x56xi1> to vector<16x56xi32>
    %24 = arith.sitofp %23 : vector<16x56xi32> to vector<16x56xf32>
    %25 = arith.addf %19, %24 : vector<16x56xf32>
    %c0_4 = arith.constant 0 : index
    %c4 = arith.constant 4 : index
    %26 = vector.load %arg1[%c0_4, %c4] : memref<16x5xi32, #tpu.memory_space<vmem>>, vector<16x1xi32>
    %27 = vector.broadcast %26 : vector<16x1xi32> to vector<16x56xi32>
    %28 = arith.cmpi eq, %0, %27 : vector<16x56xi32>
    %29 = arith.extui %28 : vector<16x56xi1> to vector<16x56xi32>
    %30 = arith.sitofp %29 : vector<16x56xi32> to vector<16x56xf32>
    %31 = arith.addf %25, %30 : vector<16x56xf32>
    %c0_5 = arith.constant 0 : index
    %c0_6 = arith.constant 0 : index
    %32 = vector.load %arg2[%c0_5, %c0_6] : memref<56x128xf32, #tpu.memory_space<vmem>>, vector<56x128xf32>
    %cst_7 = arith.constant dense<0.000000e+00> : vector<16x128xf32>
    %33 = tpu.matmul %31, %32, %cst_7 {dimension_numbers = #tpu.dot_dimension_numbers<[1], [0], [0], [1], [0, 0, 1, 1], [], []>} : vector<16x56xf32>, vector<56x128xf32>, vector<16x128xf32> -> vector<16x128xf32>
    %c0_8 = arith.constant 0 : index
    %c0_9 = arith.constant 0 : index
    %34 = vector.load %arg3[%c0_8, %c0_9] : memref<16x128xf32, #tpu.memory_space<vmem>>, vector<16x128xf32>
    tpu.vector_store %arg3[%c0_8, %c0_9], %33 {strides = array<i32>} : memref<16x128xf32, #tpu.memory_space<vmem>>, vector<16x128xf32>,
    return
  }
  func.func @transform_0(%arg0: i32) -> (i32, i32) {
    %c0_i32 = arith.constant 0 : i32
    %c0_i32_0 = arith.constant 0 : i32
    return %arg0, %c0_i32 : i32, i32
  }
  func.func @transform_1(%arg0: i32) -> (i32, i32) {
    %c0_i32 = arith.constant 0 : i32
    %c0_i32_0 = arith.constant 0 : i32
    %c0_i32_1 = arith.constant 0 : i32
    return %c0_i32, %c0_i32_0 : i32, i32
  }
  func.func @transform_2(%arg0: i32) -> (i32, i32) {
    %c0_i32 = arith.constant 0 : i32
    %c0_i32_0 = arith.constant 0 : i32
    return %arg0, %c0_i32 : i32, i32
  }
}

</mosaic_0001>

<bundles_post_ra>
// kernel: tpu_custom_call.1
= control target key start
LH: loop header
LB: loop body
LE: loop exit
PB: predicated region body
PF: predicated region fallthrough
CT: control target
= control target key end

     0   :  { %7 = vsyncpa [#allocation3], 0  ;;  %s352_s0 = inlined_call_operand.vmem [shape: s32[16,5], index: 0, kind: input, shape index: {}]   ;;  %s353_s1 = inlined_call_operand.hbm [shape: f32[56,128], index: 1, kind: input, shape index: {}]   ;;  %s354_s2 = inlined_call_operand.hbm [shape: f32[16,128], index: 2, kind: output, shape index: {}]  }
   0x1   :  { %8 = vsyncpa [#allocation4], 0  ;;  %s309_s9 = smov [#allocation2]  }
   0x2   :  { %s16_s10 = sshll.u32 %s309_s9, 4  ;;  %s17_s10 = int_to_ptr.vmem [resolvable:$true] %s16_s10 }
   0x3   :  { %s273_s11 = scalar_lea.vmem %s17_s10, 896  ;;  %p278_p1 = scmp.lt.s32.totalorder %s17_s10, %s17_s10 }
   0x4   :  { %p274_p0 = scmp.ne.s32.totalorder %s17_s10, %s273_s11  ;;  %p279_p2 = scmp.lt.s32.totalorder %s273_s11, %s273_s11 }
   0x6   :  { %p280_p3 = por %p279_p2, %p278_p1 }
   0x8   :  { %p281_p4 = pnand %p280_p3, %p274_p0 }
   0xa   :  { %284 = shalt.err (!%p281_p4)
}
   0xb   :  { %s310_s12 = smov 128   ;;  %s311_s13 = smov 8  }
   0xc   :  { %22 = dma.hbm_to_vmem [thread:$0]  %s353_s1, 896, %s17_s10, [#allocation3], %s310_s12, %s310_s12, %s311_s13  }
   0xd   :  { %305 = dma.done.wait [#allocation3], 896  }
   0xe   :  { %306 = vsyncadd [#allocation3], 4294966400  ;;  %v312_v0 = vmov 0   ;;  %v29_v1 = vld [vmem:[%s352_s0 + $0x8] sm:$0xff]  ;;  %v28_v2 = vld [vmem:[%s352_s0] sm:$0xff]  ;;  %v313_v3 = vmov 1   ;;  %v26_v14 = vlaneseq }
   0xf   :  { %258 = vset.pattern.permute.xlu1 %v312_v0  ;;  %256 = vset.pattern.permute.xlu0 %v312_v0  ;;  %v106_v4 = vld [vmem:[#allocation2 + $0x30] sm:$0xff]  ;;  %v314_v5 = vmov 2   ;;  %v105_v6 = vld [vmem:[#allocation2 + $0x28] sm:$0xff]  ;;  %v315_v7 = vmov 3   ;;  %v316_v8 = vmov 4   ;;  %v104_v9 = vld [vmem:[#allocation2 + $0x20] sm:$0xff] }
  0x10   :  { %34 = vperm.xlu1 %258, %v29_v1   ;;  %31 = vperm.xlu0 %256, %v28_v2   ;;  %v103_v10 = vld [vmem:[#allocation2 + $0x18] sm:$0xff]  ;;  %v102_v11 = vld [vmem:[#allocation2 + $0x10] sm:$0xff]  ;;  %v101_v12 = vld [vmem:[#allocation2 + $0x8] sm:$0xff]  ;;  %v27_v17 = vand.u32 127, %v26_v14  ;;  %v317_v20 = vmov 0.0   ;;  %vm107_vm8 = vcmask 457728  }
  0x11   :  { %229 = vmatprep.subr.mxu0 %v106_v4  ;;  %v100_v13 = vld [vmem:[#allocation2] sm:$0xff]  ;;  %s318_s0 = smov [#allocation5]  }
  0x12   :  { %230 = vmatpush3.msra.mxu0 %v106_v4  ;;  %s196_s1 = sshll.u32 %s318_s0, 4  ;;  %s197_s1 = int_to_ptr.vmem [resolvable:$true] %s196_s1 }
  0x13   :  { %231 = vmatprep.subr.mxu0 %v105_v6  ;;  %s285_s20 = scalar_lea.vmem %s197_s1, 256  ;;  %p290_p6 = scmp.lt.s32.totalorder %s197_s1, %s197_s1 }
  0x14   :  { %259 = vset.pattern.permute.xlu1 %v313_v3  ;;  %257 = vset.pattern.permute.xlu0 %v313_v3  ;;  %p286_p5 = scmp.ne.s32.totalorder %s197_s1, %s285_s20  ;;  %p291_p7 = scmp.lt.s32.totalorder %s285_s20, %s285_s20 }
  0x15   :  { %48 = vperm.xlu1 %259, %v29_v1   ;;  %45 = vperm.xlu0 %257, %v28_v2  }
  0x16   :  { %232 = vmatpush3.msra.mxu0 %v105_v6  ;;  %p292_p8 = por %p291_p7, %p290_p6 }
  0x17   :  { %233 = vmatprep.subr.mxu0 %v104_v9 }
  0x18   :  { %234 = vmatpush3.msra.mxu0 %v104_v9  ;;  %p293_p9 = pnand %p292_p8, %p286_p5 }
  0x19   :  { %260 = vset.pattern.permute.xlu1 %v314_v5  ;;  %261 = vset.pattern.permute.xlu0 %v314_v5 }
  0x1a   :  { %59 = vperm.xlu1 %260, %v28_v2   ;;  %62 = vperm.xlu0 %261, %v29_v1  }
  0x1b   :  { %235 = vmatprep.subr.mxu0 %v103_v10 }
  0x1c   :  { %236 = vmatpush3.msra.mxu0 %v103_v10 }
  0x1d   :  { %237 = vmatprep.subr.mxu0 %v102_v11 }
  0x1e   :  { %262 = vset.pattern.permute.xlu1 %v315_v7  ;;  %263 = vset.pattern.permute.xlu0 %v316_v8 }
  0x1f   :  { %73 = vperm.xlu1 %262, %v28_v2   ;;  %87 = vperm.xlu0 %263, %v28_v2  }
  0x20   :  { %238 = vmatpush3.msra.mxu0 %v102_v11 }
  0x21   :  { %239 = vmatprep.subr.mxu0 %v101_v12 }
  0x22   :  { %240 = vmatpush3.msra.mxu0 %v101_v12 }
  0x23   :  { %76 = vperm.xlu1 %262, %v29_v1   ;;  %241 = vmatprep.subr.mxu0 %v100_v13 }
  0x24   :  { %242 = vmatpush3.msra.mxu0 %v100_v13 }
  0x27   :  { %264 = vset.pattern.permute.xlu1 %v316_v8 }
  0x28   :  { %90 = vperm.xlu1 %264, %v29_v1  }
  0x8b   :  { %v35_v15 = vpop.permute.xlu1 %34  ;;  %v32_v16 = vpop.permute.xlu0 %31 }
  0x8c   :  { %vm36_vm0 = vcmp.eq.s32.totalorder %v27_v17, %v32_v16  ;;  %vm37_vm6 = vcmp.eq.s32.totalorder %v27_v17, %v35_v15 }
  0x8d   :  { %v208_v21 = vsel %vm36_vm0, 1.0, %v317_v20  ;;  %v209_v35 = vsel %vm37_vm6, 1.0, %v317_v20 }
  0x90   :  { %v49_v18 = vpop.permute.xlu1 %48  ;;  %v46_v19 = vpop.permute.xlu0 %45 }
  0x91   :  { %vm50_vm1 = vcmp.eq.s32.totalorder %v27_v17, %v46_v19  ;;  %vm51_vm3 = vcmp.eq.s32.totalorder %v27_v17, %v49_v18 }
  0x92   :  { %v210_v22 = vsel %vm50_vm1, 1.0, %v317_v20  ;;  %v211_v32 = vsel %vm51_vm3, 1.0, %v317_v20 }
  0x93   :  { %v56_v25 = vadd.f32 %v210_v22, %v208_v21  ;;  %v57_v38 = vadd.f32 %v211_v32, %v209_v35 }
  0x95   :  { %v60_v23 = vpop.permute.xlu1 %59  ;;  %v63_v24 = vpop.permute.xlu0 %62 }
  0x96   :  { %vm64_vm2 = vcmp.eq.s32.totalorder %v27_v17, %v60_v23  ;;  %vm65_vm7 = vcmp.eq.s32.totalorder %v27_v17, %v63_v24 }
  0x97   :  { %v212_v26 = vsel %vm64_vm2, 1.0, %v317_v20  ;;  %v213_v36 = vsel %vm65_vm7, 1.0, %v317_v20 }
  0x98   :  { %v70_v29 = vadd.f32 %v212_v26, %v56_v25  ;;  %v71_v40 = vadd.f32 %v213_v36, %v57_v38 }
  0x9a   :  { %v74_v27 = vpop.permute.xlu1 %73  ;;  %v88_v28 = vpop.permute.xlu0 %87 }
  0x9b   :  { %vm78_vm4 = vcmp.eq.s32.totalorder %v27_v17, %v74_v27  ;;  %vm92_vm5 = vcmp.eq.s32.totalorder %v27_v17, %v88_v28 }
  0x9c   :  { %v214_v30 = vsel %vm78_vm4, 1.0, %v317_v20  ;;  %v216_v31 = vsel %vm92_vm5, 1.0, %v317_v20 }
  0x9d   :  { %v84_v33 = vadd.f32 %v214_v30, %v70_v29 }
  0x9e   :  { %v77_v34 = vpop.permute.xlu1 %76 }
  0x9f   :  { %vm79_vm9 = vcmp.eq.s32.totalorder %v27_v17, %v77_v34  ;;  %v98_v37 = vadd.f32 %v216_v31, %v84_v33 }
  0xa0   :  { %v215_v39 = vsel %vm79_vm9, 1.0, %v317_v20 }
  0xa1   :  { %243 = vmatprep.mubr.msk.f32.mxu0 %vm107_vm8, %v98_v37  ;;  %v85_v42 = vadd.f32 %v215_v39, %v71_v40 }
  0xa3   :  { %v91_v41 = vpop.permute.xlu1 %90 }
  0xa4   :  { %vm93_vm10 = vcmp.eq.s32.totalorder %v27_v17, %v91_v41 }
  0xa5   :  { %v217_v43 = vsel %vm93_vm10, 1.0, %v317_v20 }
  0xa6   :  { %v99_v44 = vadd.f32 %v217_v43, %v85_v42 }
  0xa8   :  { %244 = vmatmul.mubr.msk.f32.vlgmr.msra.gmra.mxu0 %vm107_vm8, %v99_v44 }
 0x168   :  { %v245_v45 = vpop.f32.mrf.mxu0 }
 0x169   :  { %190 = vst [vmem:[#allocation5 + $0x8] sm:$0xff] %v245_v45 }
 0x16a   :  { %v180_v46 = vpop.f32.mrf.mxu0 }
 0x16b   :  { %189 = vst [vmem:[#allocation5] sm:$0xff] %v180_v46 }
 0x16c   :  { %296 = shalt.err (!%p293_p9)
}
 0x16d   :  { %202 = dma.vmem_to_hbm [thread:$0]  %s197_s1, 256, %s354_s2, [#allocation4], %s310_s12, %s310_s12, %s311_s13  }
 0x16e   :  { %307 = dma.done.wait [#allocation4], 256  }
 0x16f   :  { %308 = vsyncadd [#allocation4], 4294967040 }
 0x170   :  { %206 = vsyncpa [#allocation3], 1 }
 0x171   :  { %207 = vsyncpa [#allocation4], 1 }

</bundles_post_ra>
